<compile_context>
chip_gen: v5e
topology: v5e:2x2
jax: 0.10.0
libtpu: 0.0.40
codegen_flags: <defaults>
</compile_context>

<pallas_src>
import functools

import jax
import jax.numpy as jnp
from jax import lax
from jax.experimental import pallas as pl
from jax.experimental.pallas import tpu as pltpu

HIGH = lax.Precision.HIGHEST  # used only by the pure-JAX reference


# ----------------------------------------------------------------------------
# Kernel A: fused g/theta/phi 1x1 convs + spatial & channel attention -> y_s, y_c
# ----------------------------------------------------------------------------
def _attn_kernel(x_ref, pw_ref, pb_ref, ys_ref, yc_ref, *, ic):
    xi = x_ref[0]                                               # (ic, N) bf16

    # one fused projection matmul: rows [0:ic]=g, [ic:2ic]=theta, [2ic:3ic]=phi
    proj = lax.dot_general(pw_ref[...], xi, (((1,), (0,)), ((), ())),
                           preferred_element_type=jnp.float32) + pb_ref[...]
    g_x = proj[0:ic]                                            # (ic, N) f32
    th = proj[ic:2 * ic]                                        # (ic, N) f32
    ph = proj[2 * ic:3 * ic]                                    # (ic, N) f32

    thb = th.astype(jnp.bfloat16)
    phb = ph.astype(jnp.bfloat16)
    gxb = g_x.astype(jnp.bfloat16)

    # TODO(synk): tile this over keys with an online softmax (flash-style) so the
    # (N, N) score block never materializes when N is large (v7x VMEM = 64 MiB).

    # spatial attention: f_s[n, k] = sum_m th[m, n] * ph[m, k]   -> (N, N)
    f_s = lax.dot_general(thb, phb, (((0,), (0,)), ((), ())),
                          preferred_element_type=jnp.float32)
    f_s = f_s - jnp.max(f_s, axis=-1, keepdims=True)
    e_s = jnp.exp(f_s)
    a_s = e_s * pl.reciprocal(jnp.sum(e_s, axis=-1, keepdims=True), approx=True)

    # channel attention: f_c[i, j] = sum_n th[i, n] * ph[j, n]   -> (ic, ic)
    f_c = lax.dot_general(thb, phb, (((1,), (1,)), ((), ())),
                          preferred_element_type=jnp.float32)
    f_c = f_c - jnp.max(f_c, axis=-1, keepdims=True)
    e_c = jnp.exp(f_c)
    a_c = e_c * pl.reciprocal(jnp.sum(e_c, axis=-1, keepdims=True), approx=True)

    # y_s[i, k] = sum_n g_x[i, n] * a_s[k, n]   -> (ic, N)
    ys_ref[0] = lax.dot_general(gxb, a_s.astype(jnp.bfloat16),
                                (((1,), (1,)), ((), ())),
                                preferred_element_type=jnp.float32
                                ).astype(ys_ref.dtype)
    # y_c[n, j] = sum_i g_x[i, n] * a_c[i, j]   -> (N, ic)
    yc_ref[0] = lax.dot_general(gxb, a_c.astype(jnp.bfloat16),
                                (((0,), (0,)), ((), ())),
                                preferred_element_type=jnp.float32
                                ).astype(yc_ref.dtype)


# ----------------------------------------------------------------------------
# Kernel B: fused residual (z = x + gamma_s*W_s(y_s) + gamma_c*W_c(y_c))
#           + getmask head (conv3x3 C->16, ReLU, conv3x3 16->1, sigmoid)
# ----------------------------------------------------------------------------
def _residual_getmask_kernel(x_ref, ys_ref, yc_ref,
                             wsw_ref, wsb_ref, wcw_ref, wcb_ref,
                             w1_ref, b1_ref, w2_ref, scal_ref,
                             z_ref, mask_ref,
                             zpad_ref, h1pad_ref, *, C, H, W):
    HW = H * W
    OFF = W + 1                       # flat zero-padding on each side of a row-major image

    x = x_ref[0]                      # (C, HW) f32
    ys = ys_ref[0]                    # (C, HW) bf16
    yc = yc_ref[0]                    # (C, HW) bf16

    # 1x1 convs (channel matmuls), bf16 operands, f32 accumulation.
    ws = lax.dot_general(wsw_ref[...], ys, (((1,), (0,)), ((), ())),
                         preferred_element_type=jnp.float32) + wsb_ref[...]
    wc = lax.dot_general(wcw_ref[...], yc, (((1,), (0,)), ((), ())),
                         preferred_element_type=jnp.float32) + wcb_ref[...]
    z = x + scal_ref[0] * ws + scal_ref[1] * wc                    # (C, HW) f32
    z_ref[0] = z

    # --- stage z into a flat-padded scratch: zeros handle vertical out-of-range ---
    zpad_ref[...] = jnp.zeros(zpad_ref.shape, zpad_ref.dtype)
    zpad_ref[:, OFF:OFF + HW] = z

    # column-validity masks (kill horizontal wrap of the flattened row-major layout)
    col = lax.broadcasted_iota(jnp.int32, (1, HW), 1) % W
    m_neg = col >= 1                   # dx == -1
    m_pos = col <= W - 2               # dx == +1

    def col_mask(dx):
        if dx < 0:
            return m_neg
        if dx > 0:
            return m_pos
        return None

    # --- conv1 (3x3, C->16): 9 shifted, masked windows x (16, C) weight slices on the MXU ---
    acc1 = jnp.zeros((16, HW), jnp.float32)
    k = 0
    for dy in (-1, 0, 1):
        for dx in (-1, 0, 1):
            s = dy * W + dx
            win = zpad_ref[:, OFF + s:OFF + s + HW]                # (C, HW) f32
            cm = col_mask(dx)
            if cm is not None:
                win = jnp.where(cm, win, jnp.zeros_like(win))
            acc1 = acc1 + lax.dot_general(
                w1_ref[k], win.astype(jnp.bfloat16),
                (((1,), (0,)), ((), ())),
                preferred_element_type=jnp.float32)
            k += 1
    h1 = jnp.maximum(acc1 + b1_ref[...], 0.0)                      # (16, HW) f32

    # --- conv2 (3x3, 16->1): VPU broadcast-FMAs over the 9 shifts + one sublane reduce ---
    h1pad_ref[...] = jnp.zeros(h1pad_ref.shape, h1pad_ref.dtype)
    h1pad_ref[:, OFF:OFF + HW] = h1
    acc2 = jnp.zeros((16, HW), jnp.float32)
    k = 0
    for dy in (-1, 0, 1):
        for dx in (-1, 0, 1):
            s = dy * W + dx
            win = h1pad_ref[:, OFF + s:OFF + s + HW]               # (16, HW) f32
            cm = col_mask(dx)
            if cm is not None:
                win = jnp.where(cm, win, jnp.zeros_like(win))
            acc2 = acc2 + w2_ref[k] * win                          # (16,1) * (16,HW)
            k += 1
    logits = jnp.sum(acc2, axis=0, keepdims=True) + scal_ref[2]    # (1, HW)
    mask_ref[0] = jax.nn.sigmoid(logits)


# ----------------------------------------------------------------------------
# Wrapper
# ----------------------------------------------------------------------------
def sccm_pallas(x, p):
    B, C, H, W = x.shape
    r = p["r"]
    ic = C * r * r
    N = (H // r) * (W // r)
    HW = H * W
    HWp = HW + 2 * (W + 1)

    cp = pltpu.CompilerParams(dimension_semantics=("parallel",))
    bf16 = jnp.bfloat16

    # ---- Kernel A: attention core (bf16 activations/weights, f32 accumulation) ----
    x_icb = x.reshape(B, ic, N).astype(bf16)
    pw = jnp.concatenate([p["g_w"], p["theta_w"], p["phi_w"]], axis=0).astype(bf16)
    pb = jnp.concatenate([p["g_b"], p["theta_b"], p["phi_b"]]).reshape(3 * ic, 1)
    pb = pb.astype(jnp.float32)

    ys, yc = pl.pallas_call(
        functools.partial(_attn_kernel, ic=ic),
        out_shape=(jax.ShapeDtypeStruct((B, ic, N), bf16),
                   jax.ShapeDtypeStruct((B, N, ic), bf16)),
        grid=(B,),
        in_specs=[
            pl.BlockSpec((1, ic, N), lambda b: (b, 0, 0)),
            pl.BlockSpec((3 * ic, ic), lambda b: (0, 0)),
            pl.BlockSpec((3 * ic, 1), lambda b: (0, 0)),
        ],
        out_specs=(pl.BlockSpec((1, ic, N), lambda b: (b, 0, 0)),
                   pl.BlockSpec((1, N, ic), lambda b: (b, 0, 0))),
        compiler_params=cp,
    )(x_icb, pw, pb)

    # raw-flat reinterpretations (free in HBM), exactly as torch's .view calls
    ys_chw = ys.reshape(B, C, HW)       # (ic, N) contiguous -> (C, H, W)
    yc_chw = yc.reshape(B, C, HW)       # (N, ic) contiguous -> (C, H, W)
    x_chw = x.reshape(B, C, HW)         # f32 identity path for the residual

    # ---- Kernel B: residual fusion + getmask, fully fused (no im2col, no HBM h1) ----
    w1_r = jnp.transpose(p["m1_w"], (2, 3, 0, 1)).reshape(9, 16, C).astype(bf16)
    w2_r = jnp.transpose(p["m2_w"], (2, 3, 1, 0)).reshape(9, 16, 1).astype(jnp.float32)
    scal = jnp.stack([p["gamma_s"], p["gamma_c"], p["m2_b"][0]]).astype(jnp.float32)

    z_chw, mask_flat = pl.pallas_call(
        functools.partial(_residual_getmask_kernel, C=C, H=H, W=W),
        out_shape=(jax.ShapeDtypeStruct((B, C, HW), jnp.float32),
                   jax.ShapeDtypeStruct((B, 1, HW), jnp.float32)),
        grid=(B,),
        in_specs=[
            pl.BlockSpec((1, C, HW), lambda b: (b, 0, 0)),     # x (f32 residual)
            pl.BlockSpec((1, C, HW), lambda b: (b, 0, 0)),     # y_s (bf16)
            pl.BlockSpec((1, C, HW), lambda b: (b, 0, 0)),     # y_c (bf16)
            pl.BlockSpec((C, C), lambda b: (0, 0)),            # W_s weight
            pl.BlockSpec((C, 1), lambda b: (0, 0)),            # W_s bias
            pl.BlockSpec((C, C), lambda b: (0, 0)),            # W_c weight
            pl.BlockSpec((C, 1), lambda b: (0, 0)),            # W_c bias
            pl.BlockSpec((9, 16, C), lambda b: (0, 0, 0)),     # conv1 weight (per shift)
            pl.BlockSpec((16, 1), lambda b: (0, 0)),           # conv1 bias
            pl.BlockSpec((9, 16, 1), lambda b: (0, 0, 0)),     # conv2 weight (per shift)
            pl.BlockSpec(memory_space=pltpu.MemorySpace.SMEM),  # [gamma_s, gamma_c, conv2 bias]
        ],
        out_specs=(pl.BlockSpec((1, C, HW), lambda b: (b, 0, 0)),
                   pl.BlockSpec((1, 1, HW), lambda b: (b, 0, 0))),
        scratch_shapes=[pltpu.VMEM((C, HWp), jnp.float32),      # flat-padded z
                        pltpu.VMEM((16, HWp), jnp.float32)],    # flat-padded h1
        compiler_params=cp,
    )(x_chw, ys_chw, yc_chw,
      p["ws_w"].astype(bf16), p["ws_b"].reshape(C, 1).astype(jnp.float32),
      p["wc_w"].astype(bf16), p["wc_b"].reshape(C, 1).astype(jnp.float32),
      w1_r, p["m1_b"].reshape(16, 1).astype(jnp.float32), w2_r, scal)

    z = z_chw.reshape(B, C, H, W)
    mask = mask_flat.reshape(B, 1, H, W)
    return mask, z


# ----------------------------------------------------------------------------
# Pure-JAX reference (mirrors the PyTorch forward exactly, f32 HIGHEST)
# ----------------------------------------------------------------------------
def sccm_ref(x, p):
    b, c, h, w = x.shape
    r = p["r"]
    ic = c * r * r
    x1 = x.reshape(b, ic, -1)                                        # (b, ic, N)

    def conv1x1(w_, b_, inp):
        return jnp.einsum("oi,bin->bon", w_, inp, precision=HIGH) + b_[None, :, None]

    g_x = conv1x1(p["g_w"], p["g_b"], x1)
    g_x_t = jnp.swapaxes(g_x, 1, 2)                                  # (b, N, ic)
    th = conv1x1(p["theta_w"], p["theta_b"], x1)
    ph = conv1x1(p["phi_w"], p["phi_b"], x1)

    f_s = jax.nn.softmax(jnp.einsum("bmn,bmk->bnk", th, ph, precision=HIGH), axis=-1)
    f_c = jax.nn.softmax(jnp.einsum("bin,bjn->bij", th, ph, precision=HIGH), axis=-1)

    y_s = jnp.einsum("bnk,bki->bni", f_s, g_x_t, precision=HIGH)     # (b, N, ic)
    y_s = jnp.swapaxes(y_s, 1, 2).reshape(b, c, h, w)
    y_c = jnp.einsum("bni,bij->bnj", g_x_t, f_c, precision=HIGH)     # (b, N, ic)
    y_c = y_c.reshape(b, c, h, w)

    def conv1x1_hw(w_, b_, inp):
        return jnp.einsum("oi,bihw->bohw", w_, inp, precision=HIGH) + b_[None, :, None, None]

    z = x + p["gamma_s"] * conv1x1_hw(p["ws_w"], p["ws_b"], y_s) \
          + p["gamma_c"] * conv1x1_hw(p["wc_w"], p["wc_b"], y_c)

    def conv3x3(w_, b_, inp):
        out = lax.conv_general_dilated(inp, w_, (1, 1), "SAME",
                                       dimension_numbers=("NCHW", "OIHW", "NCHW"),
                                       precision=HIGH)
        return out + b_[None, :, None, None]

    h1 = jax.nn.relu(conv3x3(p["m1_w"], p["m1_b"], z))
    mask = jax.nn.sigmoid(conv3x3(p["m2_w"], p["m2_b"], h1))
    return mask, z


# ----------------------------------------------------------------------------
def init_params(key, C, R):
    ic = C * R * R
    ks = jax.random.split(key, 14)

    def w(k, shape, scale=0.1):
        return (scale * jax.random.normal(k, shape)).astype(jnp.float32)

    return dict(
        r=R,
        g_w=w(ks[0], (ic, ic)), g_b=w(ks[1], (ic,)),
        theta_w=w(ks[2], (ic, ic)), theta_b=w(ks[3], (ic,)),
        phi_w=w(ks[4], (ic, ic)), phi_b=w(ks[5], (ic,)),
        ws_w=w(ks[6], (C, C)), ws_b=w(ks[7], (C,)),
        wc_w=w(ks[8], (C, C)), wc_b=w(ks[9], (C,)),
        gamma_s=jnp.ones((), jnp.float32),
        gamma_c=jnp.ones((), jnp.float32),
        m1_w=w(ks[10], (16, C, 3, 3)), m1_b=w(ks[11], (16,)),
        m2_w=w(ks[12], (1, 16, 3, 3)), m2_b=w(ks[13], (1,)),
    )


if __name__ == "__main__":
    B, C, H, W, R = 2, 4, 16, 16, 2
    key = jax.random.PRNGKey(0)
    pkey, xkey = jax.random.split(key)
    params = init_params(pkey, C, R)
    x = jax.random.normal(xkey, (B, C, H, W), jnp.float32)

    mask, z = sccm_pallas(x, params)
    jax.block_until_ready((mask, z))

    mask_ref, z_ref = sccm_ref(x, params)
    assert mask.shape == (B, 1, H, W) and z.shape == (B, C, H, W)
    # Tolerance accounts for bf16 MXU operands with f32 accumulation (per perf review).
    assert bool(jnp.allclose(z, z_ref, atol=2e-2, rtol=2e-2)), "z mismatch"
    assert bool(jnp.allclose(mask, mask_ref, atol=2e-2, rtol=2e-2)), "mask mismatch"

    print("KERNEL_OK")
</pallas_src>

<mosaic_0001>
module attributes {stable_mosaic.version = 11 : i64} {
  func.func @_attn_kernel(%arg0: i32, %arg1: memref<1x16x64xbf16, #tpu.memory_space<vmem>>, %arg2: memref<48x16xbf16, #tpu.memory_space<vmem>>, %arg3: memref<48x1xf32, #tpu.memory_space<vmem>>, %arg4: memref<1x16x64xbf16, #tpu.memory_space<vmem>>, %arg5: memref<1x64x16xbf16, #tpu.memory_space<vmem>>) attributes {dimension_semantics = [#tpu.dimension_semantics<parallel>], iteration_bounds = array<i64: 2>, scalar_prefetch = 0 : i64, scratch_operands = 0 : i64, tpu.core_type = #tpu.core_type<tc>, window_params = [{transform_indices = @transform_0, window_bounds = array<i64: 1, 16, 64>}, {pipeline_mode = #tpu.pipeline_mode<synchronous>, transform_indices = @transform_1, window_bounds = array<i64: 48, 16>}, {pipeline_mode = #tpu.pipeline_mode<synchronous>, transform_indices = @transform_2, window_bounds = array<i64: 48, 1>}, {transform_indices = @transform_3, window_bounds = array<i64: 1, 16, 64>}, {transform_indices = @transform_4, window_bounds = array<i64: 1, 64, 16>}]} {
    %c0 = arith.constant 0 : index
    %c0_0 = arith.constant 0 : index
    %c0_1 = arith.constant 0 : index
    %0 = vector.load %arg1[%c0, %c0_0, %c0_1] : memref<1x16x64xbf16, #tpu.memory_space<vmem>>, vector<1x16x64xbf16>
    %1 = vector.shape_cast %0 : vector<1x16x64xbf16> to vector<16x64xbf16>
    %c0_2 = arith.constant 0 : index
    %c0_3 = arith.constant 0 : index
    %2 = vector.load %arg2[%c0_2, %c0_3] : memref<48x16xbf16, #tpu.memory_space<vmem>>, vector<48x16xbf16>
    %cst = arith.constant dense<0.000000e+00> : vector<48x64xf32>
    %3 = tpu.matmul %2, %1, %cst {dimension_numbers = #tpu.dot_dimension_numbers<[1], [0], [0], [1], [0, 0, 1, 1], [], []>} : vector<48x16xbf16>, vector<16x64xbf16>, vector<48x64xf32> -> vector<48x64xf32>
    %c0_4 = arith.constant 0 : index
    %c0_5 = arith.constant 0 : index
    %4 = vector.load %arg3[%c0_4, %c0_5] : memref<48x1xf32, #tpu.memory_space<vmem>>, vector<48x1xf32>
    %5 = vector.broadcast %4 : vector<48x1xf32> to vector<48x64xf32>
    %6 = arith.addf %3, %5 : vector<48x64xf32>
    %7 = vector.extract_strided_slice %6 {offsets = [0, 0], sizes = [16, 64], strides = [1, 1]} : vector<48x64xf32> to vector<16x64xf32>
    %8 = vector.extract_strided_slice %6 {offsets = [16, 0], sizes = [16, 64], strides = [1, 1]} : vector<48x64xf32> to vector<16x64xf32>
    %9 = vector.extract_strided_slice %6 {offsets = [32, 0], sizes = [16, 64], strides = [1, 1]} : vector<48x64xf32> to vector<16x64xf32>
    %10 = arith.truncf %8 : vector<16x64xf32> to vector<16x64xbf16>
    %11 = arith.truncf %9 : vector<16x64xf32> to vector<16x64xbf16>
    %12 = arith.truncf %7 : vector<16x64xf32> to vector<16x64xbf16>
    %cst_6 = arith.constant dense<0.000000e+00> : vector<64x64xf32>
    %13 = tpu.matmul %10, %11, %cst_6 {dimension_numbers = #tpu.dot_dimension_numbers<[0], [0], [1], [1], [0, 1, 1, 1], [], []>} : vector<16x64xbf16>, vector<16x64xbf16>, vector<64x64xf32> -> vector<64x64xf32>
    %cst_7 = arith.constant dense<0xFF800000> : vector<64xf32>
    %14 = vector.multi_reduction <maximumf>, %13, %cst_7 [1] : vector<64x64xf32> to vector<64xf32>
    %15 = vector.shape_cast %14 : vector<64xf32> to vector<64x1xf32>
    %16 = vector.broadcast %15 : vector<64x1xf32> to vector<64x64xf32>
    %17 = arith.subf %13, %16 : vector<64x64xf32>
    %18 = math.exp %17 : vector<64x64xf32>
    %cst_8 = arith.constant dense<0.000000e+00> : vector<64xf32>
    %19 = vector.multi_reduction <add>, %18, %cst_8 [1] : vector<64x64xf32> to vector<64xf32>
    %20 = vector.shape_cast %19 : vector<64xf32> to vector<64x1xf32>
    %21 = tpu.reciprocal %20 {approx = true} : vector<64x1xf32> -> vector<64x1xf32>
    %22 = vector.broadcast %21 : vector<64x1xf32> to vector<64x64xf32>
    %23 = arith.mulf %18, %22 : vector<64x64xf32>
    %cst_9 = arith.constant dense<0.000000e+00> : vector<16x16xf32>
    %24 = tpu.matmul %10, %11, %cst_9 {dimension_numbers = #tpu.dot_dimension_numbers<[1], [1], [0], [0], [0, 0, 1, 0], [], []>} : vector<16x64xbf16>, vector<16x64xbf16>, vector<16x16xf32> -> vector<16x16xf32>
    %cst_10 = arith.constant dense<0xFF800000> : vector<16xf32>
    %25 = vector.multi_reduction <maximumf>, %24, %cst_10 [1] : vector<16x16xf32> to vector<16xf32>
    %26 = vector.shape_cast %25 : vector<16xf32> to vector<16x1xf32>
    %27 = vector.broadcast %26 : vector<16x1xf32> to vector<16x16xf32>
    %28 = arith.subf %24, %27 : vector<16x16xf32>
    %29 = math.exp %28 : vector<16x16xf32>
    %cst_11 = arith.constant dense<0.000000e+00> : vector<16xf32>
    %30 = vector.multi_reduction <add>, %29, %cst_11 [1] : vector<16x16xf32> to vector<16xf32>
    %31 = vector.shape_cast %30 : vector<16xf32> to vector<16x1xf32>
    %32 = tpu.reciprocal %31 {approx = true} : vector<16x1xf32> -> vector<16x1xf32>
    %33 = vector.broadcast %32 : vector<16x1xf32> to vector<16x16xf32>
    %34 = arith.mulf %29, %33 : vector<16x16xf32>
    %35 = arith.truncf %23 : vector<64x64xf32> to vector<64x64xbf16>
    %cst_12 = arith.constant dense<0.000000e+00> : vector<16x64xf32>
    %36 = tpu.matmul %12, %35, %cst_12 {dimension_numbers = #tpu.dot_dimension_numbers<[1], [1], [0], [0], [0, 0, 1, 0], [], []>} : vector<16x64xbf16>, vector<64x64xbf16>, vector<16x64xf32> -> vector<16x64xf32>
    %37 = arith.truncf %36 : vector<16x64xf32> to vector<16x64xbf16>
    %c0_13 = arith.constant 0 : index
    %c0_14 = arith.constant 0 : index
    %c0_15 = arith.constant 0 : index
    %38 = vector.load %arg4[%c0_13, %c0_14, %c0_15] : memref<1x16x64xbf16, #tpu.memory_space<vmem>>, vector<1x16x64xbf16>
    %39 = vector.shape_cast %38 : vector<1x16x64xbf16> to vector<16x64xbf16>
    %40 = vector.shape_cast %37 : vector<16x64xbf16> to vector<1x16x64xbf16>
    tpu.vector_store %arg4[%c0_13, %c0_14, %c0_15], %40 {strides = array<i32>} : memref<1x16x64xbf16, #tpu.memory_space<vmem>>, vector<1x16x64xbf16>,
    %41 = arith.truncf %34 : vector<16x16xf32> to vector<16x16xbf16>
    %cst_16 = arith.constant dense<0.000000e+00> : vector<64x16xf32>
    %42 = tpu.matmul %12, %41, %cst_16 {dimension_numbers = #tpu.dot_dimension_numbers<[0], [0], [1], [1], [0, 1, 1, 1], [], []>} : vector<16x64xbf16>, vector<16x16xbf16>, vector<64x16xf32> -> vector<64x16xf32>
    %43 = arith.truncf %42 : vector<64x16xf32> to vector<64x16xbf16>
    %c0_17 = arith.constant 0 : index
    %c0_18 = arith.constant 0 : index
    %c0_19 = arith.constant 0 : index
    %44 = vector.load %arg5[%c0_17, %c0_18, %c0_19] : memref<1x64x16xbf16, #tpu.memory_space<vmem>>, vector<1x64x16xbf16>
    %45 = vector.shape_cast %44 : vector<1x64x16xbf16> to vector<64x16xbf16>
    %46 = vector.shape_cast %43 : vector<64x16xbf16> to vector<1x64x16xbf16>
    tpu.vector_store %arg5[%c0_17, %c0_18, %c0_19], %46 {strides = array<i32>} : memref<1x64x16xbf16, #tpu.memory_space<vmem>>, vector<1x64x16xbf16>,
    return
  }
  func.func @transform_0(%arg0: i32) -> (i32, i32, i32) {
    %c0_i32 = arith.constant 0 : i32
    %c0_i32_0 = arith.constant 0 : i32
    %c0_i32_1 = arith.constant 0 : i32
    return %arg0, %c0_i32, %c0_i32_0 : i32, i32, i32
  }
  func.func @transform_1(%arg0: i32) -> (i32, i32) {
    %c0_i32 = arith.constant 0 : i32
    %c0_i32_0 = arith.constant 0 : i32
    %c0_i32_1 = arith.constant 0 : i32
    return %c0_i32, %c0_i32_0 : i32, i32
  }
  func.func @transform_2(%arg0: i32) -> (i32, i32) {
    %c0_i32 = arith.constant 0 : i32
    %c0_i32_0 = arith.constant 0 : i32
    %c0_i32_1 = arith.constant 0 : i32
    return %c0_i32, %c0_i32_0 : i32, i32
  }
  func.func @transform_3(%arg0: i32) -> (i32, i32, i32) {
    %c0_i32 = arith.constant 0 : i32
    %c0_i32_0 = arith.constant 0 : i32
    %c0_i32_1 = arith.constant 0 : i32
    return %arg0, %c0_i32, %c0_i32_0 : i32, i32, i32
  }
  func.func @transform_4(%arg0: i32) -> (i32, i32, i32) {
    %c0_i32 = arith.constant 0 : i32
    %c0_i32_0 = arith.constant 0 : i32
    %c0_i32_1 = arith.constant 0 : i32
    return %arg0, %c0_i32, %c0_i32_0 : i32, i32, i32
  }
}

</mosaic_0001>

<bundles_post_ra>
// kernel: tpu_custom_call.1
= control target key start
LH: loop header
LB: loop body
LE: loop exit
PB: predicated region body
PF: predicated region fallthrough
CT: control target
= control target key end

     0   :  { %10 = vsyncpa [#allocation3], 0  ;;  %s1157_s0 = inlined_call_operand.vmem [shape: bf16[2,16,64], index: 0, kind: input, shape index: {}]   ;;  %s1158_s1 = inlined_call_operand.vmem [shape: bf16[48,16], index: 1, kind: input, shape index: {}]   ;;  %s1159_s2 = inlined_call_operand.vmem [shape: f32[48,1], index: 2, kind: input, shape index: {}]   ;;  %s1160_s3 = inlined_call_operand.hbm [shape: bf16[2,16,64], index: 3, kind: output, shape index: {0}]   ;;  %s1161_s4 = inlined_call_operand.vmem [shape: bf16[2,64,16], index: 4, kind: output, shape index: {1}]  }
   0x1   :  { %12 = vsyncpa [#allocation3 + $0x1], 0  ;;  %s950_s15 = smov 0   ;;  %s952_s16 = smov 0  }
   0x2   :  { %s954_s17 = smov 0   ;;  %s956_s18 = smov 0  }
   0x3 LB: > { %s971_s19 = sadd.s32 4294967295, %s920_s18   ;;  %s724_s20 = sadd.s32 4294967294, %s920_s18   ;;  %s920_s18 = sphi %s956_s18, %s1167_s18   ;;  %s916_s17 = sphi %s954_s17, %s1166_s17   ;;  %s912_s16 = sphi %s952_s16, %s1165_s16   ;;  %s908_s15 = sphi %s950_s15, %s1164_s15  }
   0x4   : > { %s975_s21 = sadd.s32 1, %s920_s18   ;;  %s93_s22 = sadd.s32 1, %s916_s17 }
   0x5   : > { %s90_s23 = ssub.s32 %s920_s18, %s975_s21  ;;  %p103_p0 = scmp.ne.s32.totalorder %s916_s17, %s912_s16 }
   0x6   : > { %p91_p1 = scmp.eq.s32.totalorder %s90_s23, 0  ;;  %p104_p2 = scmp.eq.s32.totalorder %s971_s19, 1 }
   0x7   : > { %p109_p3 = scmp.ne.s32.totalorder %s912_s16, %s908_s15  ;;  %p110_p4 = scmp.eq.s32.totalorder %s724_s20, 1 }
   0x8   : > { %s986_s24 = scalar_select %p91_p1, %s916_s17, %s93_s22  }
   0x9   : > { %p988_p5 = por %p104_p2, %p103_p0  ;;  %p992_p6 = por %p110_p4, %p109_p3 }
   0xa   : > { %p727_p7 = scmp.ge.s32.totalorder %s920_s18, 1  ;;  %p168_p8 = scmp.lt.s32.totalorder %s920_s18, 3 }
   0xc   : > { %p169_p9 = pnand %p727_p7, %p168_p8 }
   0xd   : > { %p199_p10 = scmp.lt.s32.totalorder (!%p169_p9), %s971_s19, 1  ;;  %s189_s8 = sand.u32 (!%p169_p9), 1, %s912_s16  }
   0xe   : > { %172 = sbr.rel (%p169_p9) target bundleno = 1068 (0x42c), region = 32  ;;  %s773_s10 = sshll.u32 (!%p169_p9), %s971_s19, 3 }
   0xf   : > { %s630_s13 = scalar_lea.hbm (!%p169_p9), %s1160_s3, %s773_s10  ;;  %s614_s23 = scalar_lea.sflag (!%p169_p9), [#allocation3], %s189_s8 }
  0x10   : > { %s633_s22 = sshll.u32 (!%p169_p9), %s630_s13, 4  ;;  %s878_s30 = scalar_lea.hbm (!%p169_p9), %s1160_s3, 16  ;;  %s634_s22 = int_to_ptr.hbm [resolvable:$true] %s633_s22 }
  0x11   : > { %s872_s27 = sshra.s32 (!%p169_p9), %s634_s22, 4  ;;  %s873_s27 = int_to_ptr.hbm [resolvable:$true] %s872_s27 }
  0x12   : > { %p879_p0 = scmp.lt.s32.totalorder (!%p169_p9), %s873_s27, %s1160_s3 }
  0x13   : > { %v222_v0 = vld [vmem:[%s1159_s2 + $0x20] sm:$0xff]  ;;  %v922_v1 = vmov 0   ;;  %v220_v2 = vld [vmem:[%s1159_s2 + $0x10] sm:$0xff]  ;;  %s1006_s5 = scalar_select %p199_p10, %s971_s19, 1  ;;  %v223_v5 = vld [vmem:[%s1159_s2 + $0x28] sm:$0xff]  ;;  %vm275_vm0 = vcmask 130048  }
  0x14   : > { %817 = vset.pattern.permute.xlu1 %v922_v1  ;;  %816 = vset.pattern.permute.xlu0 %v922_v1  ;;  %v770_v4 = vld [vmem:[%s1158_s1] sm:$0xff]  ;;  %v221_v6 = vld [vmem:[%s1159_s2 + $0x18] sm:$0xff]  ;;  %v771_v8 = vld [vmem:[%s1158_s1 + $0x8] sm:$0xff]  ;;  %vm369_vm1 = vcmask 523264   ;;  %vm535_vm2 = vcmask 519168   ;;  %s874_s19 = scalar_lea.hbm %s873_s27, 8 }
  0x15   : > { %246 = vperm.xlu1 %817, %v222_v0   ;;  %236 = vperm.xlu0 %816, %v220_v2   ;;  %s767_s6 = sshll.u32 %s1006_s5, 3  ;;  %v218_v7 = vld [vmem:[%s1159_s2] sm:$0xff]  ;;  %v772_v9 = vld [vmem:[%s1158_s1 + $0x10] sm:$0xff]  ;;  %v219_v55 = vld [vmem:[%s1159_s2 + $0x8] sm:$0xff]  ;;  %p875_p11 = scmp.ne.s32.totalorder %s873_s27, %s874_s19 }
  0x16   : > { %s203_s9 = scalar_lea.vmem %s1157_s0, %s767_s6  ;;  %p880_p1 = scmp.lt.s32.totalorder %s878_s30, %s874_s19 }
  0x17   : > { %v769_v3 = vld [vmem:[%s203_s9] sm:$0xff]  ;;  %s728_s9 = sshll.u32 %s189_s8, 3  ;;  %p876_p12 = pnand %p875_p11, %p988_p5 }
  0x18   : > { %292 = vmatpush.bf16.msra.mxu0 %v769_v3  ;;  %s191_s14 = scalar_lea.vmem [#allocation2], %s728_s9  ;;  %p881_p2 = por %p880_p1, %p879_p0 }
  0x19   : > { %s631_s20 = sshll.u32 %s191_s14, 4  ;;  %p877_p13 = pneg %p876_p12  ;;  %s632_s20 = int_to_ptr.vmem [resolvable:$true] %s631_s20 }
  0x1b   : > { %749 = vmatmul.msk.bf16.vlgmr.msra.gmra.mxu0 %vm275_vm0, %v770_v4  ;;  %p882_p3 = pnand %p881_p2, %p877_p13 }
  0x1d   : > { %251 = vperm.xlu1 %817, %v223_v5   ;;  %241 = vperm.xlu0 %816, %v221_v6  }
  0x25   : > { %226 = vperm.xlu1 %817, %v218_v7  }
  0x2b   : > { %750 = vmatmul.msk.bf16.gmra.mxu0 %vm275_vm0, %v771_v8 }
  0x3b   : > { %751 = vmatmul.msk.bf16.gmra.mxu0 %vm275_vm0, %v772_v9 }
  0x87   : > { %v237_v12 = vpop.permute.xlu0 %236  ;;  %v247_v19 = vpop.permute.xlu1 %246 }
  0x8f   : > { %v242_v14 = vpop.permute.xlu0 %241  ;;  %v252_v22 = vpop.permute.xlu1 %251 }
  0x97   : > { %v227_v62 = vpop.permute.xlu1 %226 }
  0x98   : > { %v1033_v10 = vpop.f32.mrf.mxu0 }
  0xa0   : > { %v1035_v11 = vpop.f32.mrf.mxu0 }
  0xa8   : > { %v299_v13 = vpop.f32.mrf.mxu0 }
  0xa9   : > { %v300_v16 = vadd.f32 %v299_v13, %v237_v12 }
  0xb0   : > { %v301_v15 = vpop.f32.mrf.mxu0 }
  0xb1   : > { %v302_v17 = vadd.f32 %v301_v15, %v242_v14 }
  0xb3   : > { %v309_v18 = vpack.c.bf16 %v302_v17, %v300_v16 }
  0xb5   : > { %312 = vxpose.xlu2.c.b16.start.end [1/1] (short) (narrow) %v309_v18, 64 }
  0xb8   : > { %v304_v20 = vpop.f32.mrf.mxu0 }
  0xb9   : > { %v305_v21 = vadd.f32 %v304_v20, %v247_v19 }
  0xc0   : > { %v306_v23 = vpop.f32.mrf.mxu0 }
  0xc1   : > { %v307_v24 = vadd.f32 %v306_v23, %v252_v22 }
  0xc3   : > { %v310_v25 = vpack.c.bf16 %v307_v24, %v305_v21 }
  0xc5   : > { %v462_v26 = vsel %vm369_vm1, %v310_v25, 0  ;;  %347 = vmatpush.bf16.msra.mxu1 %v310_v25 }
  0xc6   : > { %471 = vmatpush.bf16.xpose.msra.mxu3 %v462_v26 }
  0xcd   : > { %756 = vmatmul.msk.bf16.vlgmr.msra.gmra.mxu3 %vm369_vm1, %v309_v18 }
 0x150   : > { %v473_v27 = vpop.f32.mrf.mxu3 }
 0x151   : > { %v478_v28 = vsel %vm275_vm0, %v473_v27, -inf }
 0x156   : > { %v320_v29 = vpop.trf.xlu2  ;;  %479 = vmax.xlane.f32.xlu2 %v478_v28 }
 0x157   : > { %752 = vmatmul.msk.bf16.vlgmr.msra.gmra.mxu1 %vm275_vm0, %v320_v29 }
 0x158   : > { %v475_v30 = vpop.f32.mrf.mxu3 }
 0x159   : > { %v481_v31 = vsel %vm275_vm0, %v475_v30, -inf }
 0x15a   : > { %482 = vmax.xlane.f32.xlu0 %v481_v31 }
 0x166   : > { %v321_v32 = vpop.trf.xlu2 }
 0x167   : > { %753 = vmatmul.msk.bf16.gmra.mxu1 %vm275_vm0, %v321_v32 }
 0x176   : > { %v322_v33 = vpop.trf.xlu2 }
 0x177   : > { %754 = vmatmul.msk.bf16.gmra.mxu1 %vm275_vm0, %v322_v33 }
 0x186   : > { %v323_v34 = vpop.trf.xlu2 }
 0x187   : > { %755 = vmatmul.msk.bf16.gmra.mxu1 %vm275_vm0, %v323_v34 }
 0x1c9   : > { %v480_v45 = vpop.xlane.xlu2 %479 }
 0x1ca   : > { %v484_v46 = vsub.f32 %v473_v27, %v480_v45 }
 0x1cc   : > { %v486_v49 = vmul.f32 1.442695, %v484_v46 }
 0x1cd   : > { %v483_v56 = vpop.xlane.xlu0 %482 }
 0x1ce   : > { %818 = vpow2.f32 %v486_v49  ;;  %v485_v57 = vsub.f32 %v475_v30, %v483_v56 }
 0x1d0   : > { %v488_v58 = vmul.f32 1.442695, %v485_v57 }
 0x1d2   : > { %820 = vpow2.f32 %v488_v58 }
 0x1d4   : > { %v1045_v35 = vpop.f32.mrf.mxu1  ;;  %v1060_v53 = vpop.eup %818 }
 0x1d5   : > { %v370_v51 = vsel %vm369_vm1, %v1045_v35, -inf  ;;  %v490_v54 = vsel %vm275_vm0, %v1060_v53, 0.0 }
 0x1d8   : > { %v1069_v60 = vpop.eup %820 }
 0x1d9   : > { %v493_v61 = vsel %vm275_vm0, %v1069_v60, 0.0 }
 0x1dc   : > { %v1047_v36 = vpop.f32.mrf.mxu1 }
 0x1dd   : > { %v373_v59 = vsel %vm369_vm1, %v1047_v36, -inf }
 0x1e4   : > { %v1049_v37 = vpop.f32.mrf.mxu1 }
 0x1e5   : > { %v376_v38 = vsel %vm369_vm1, %v1049_v37, -inf }
 0x1e6   : > { %377 = vmax.xlane.f32.xlu1 %v376_v38 }
 0x1ec   : > { %v356_v39 = vpop.f32.mrf.mxu1 }
 0x1ed   : > { %v379_v40 = vsel %vm369_vm1, %v356_v39, -inf }
 0x1ee   : > { %380 = vmax.xlane.f32.xlu0 %v379_v40 }
 0x1f4   : > { %v359_v41 = vpop.f32.mrf.mxu1 }
 0x1f5   : > { %v382_v42 = vsel %vm369_vm1, %v359_v41, -inf }
 0x1f6   : > { %383 = vmax.xlane.f32.xlu1 %v382_v42 }
 0x1fc   : > { %v361_v43 = vpop.f32.mrf.mxu1 }
 0x1fd   : > { %v385_v44 = vsel %vm369_vm1, %v361_v43, -inf }
 0x1fe   : > { %386 = vmax.xlane.f32.xlu0 %v385_v44 }
 0x204   : > { %v364_v47 = vpop.f32.mrf.mxu1 }
 0x205   : > { %v388_v48 = vsel %vm369_vm1, %v364_v47, -inf }
 0x206   : > { %389 = vmax.xlane.f32.xlu1 %v388_v48 }
 0x20c   : > { %v366_v50 = vpop.f32.mrf.mxu1 }
 0x20d   : > { %v391_v52 = vsel %vm369_vm1, %v366_v50, -inf }
 0x20e   : > { %371 = vmax.xlane.f32.xlu1 %v370_v51  ;;  %392 = vmax.xlane.f32.xlu0 %v391_v52 }
 0x216   : > { %491 = vadd.xlane.f32.xlu1 %v490_v54 }
 0x222   : > { %231 = vperm.xlu0 %816, %v219_v55  }
 0x24c   : > { %374 = vmax.xlane.f32.xlu0 %v373_v59 }
 0x254   : > { %494 = vadd.xlane.f32.xlu0 %v493_v61 }
 0x259   : > { %v378_v63 = vpop.xlane.xlu1 %377 }
 0x25a   : > { %v396_v24 = vsub.f32 %v1049_v37, %v378_v63 }
 0x25c   : > { %v406_v26 = vmul.f32 1.442695, %v396_v24 }
 0x261   : > { %v381_v0 = vpop.xlane.xlu0 %380 }
 0x262   : > { %v397_v1 = vsub.f32 %v356_v39, %v381_v0 }
 0x264   : > { %v408_v2 = vmul.f32 1.442695, %v397_v1 }
 0x266   : > { %822 = vpow2.f32 %v408_v2 }
 0x269   : > { %v384_v3 = vpop.xlane.xlu1 %383 }
 0x26a   : > { %v398_v4 = vsub.f32 %v359_v41, %v384_v3 }
 0x26c   : > { %v1073_v5 = vpop.eup %822  ;;  %v410_v6 = vmul.f32 1.442695, %v398_v4 }
 0x26d   : > { %v427_v7 = vsel %vm369_vm1, %v1073_v5, 0.0 }
 0x26e   : > { %824 = vpow2.f32 %v410_v6  ;;  %428 = vadd.xlane.f32.xlu2 %v427_v7 }
 0x271   : > { %v387_v12 = vpop.xlane.xlu0 %386 }
 0x272   : > { %v399_v20 = vsub.f32 %v361_v43, %v387_v12 }
 0x274   : > { %v1077_v8 = vpop.eup %824  ;;  %v412_v22 = vmul.f32 1.442695, %v399_v20 }
 0x275   : > { %v430_v9 = vsel %vm369_vm1, %v1077_v8, 0.0 }
 0x276   : > { %431 = vadd.xlane.f32.xlu1 %v430_v9 }
 0x279   : > { %v390_v13 = vpop.xlane.xlu1 %389 }
 0x27a   : > { %v400_v14 = vsub.f32 %v364_v47, %v390_v13 }
 0x27c   : > { %v414_v15 = vmul.f32 1.442695, %v400_v14 }
 0x27e   : > { %826 = vpow2.f32 %v414_v15 }
 0x281   : > { %v393_v16 = vpop.xlane.xlu0 %392  ;;  %v372_v27 = vpop.xlane.xlu1 %371 }
 0x282   : > { %v401_v17 = vsub.f32 %v366_v50, %v393_v16  ;;  %v394_v29 = vsub.f32 %v1045_v35, %v372_v27  ;;  %v295_v35 = vadd.f32 %v1033_v10, %v227_v62 }
 0x284   : > { %v827_v18 = vpop.eup %826  ;;  %v416_v19 = vmul.f32 1.442695, %v401_v17  ;;  %v402_v31 = vmul.f32 1.442695, %v394_v29 }
 0x285   : > { %v436_v21 = vsel %vm369_vm1, %v827_v18, 0.0 }
 0x286   : > { %437 = vadd.xlane.f32.xlu1 %v436_v21  ;;  %828 = vpow2.f32 %v416_v19 }
 0x287   : > { %830 = vpow2.f32 %v412_v22 }
 0x288   : > { %832 = vpow2.f32 %v406_v26 }
 0x289   : > { %834 = vpow2.f32 %v402_v31  ;;  %v492_v44 = vpop.xlane.xlu1 %491 }
 0x28c   : > { %v829_v23 = vpop.eup %828 }
 0x28d   : > { %v439_v25 = vsel %vm369_vm1, %v829_v23, 0.0  ;;  %v831_v28 = vpop.eup %830 }
 0x28e   : > { %440 = vadd.xlane.f32.xlu0 %v439_v25  ;;  %v433_v30 = vsel %vm369_vm1, %v831_v28, 0.0  ;;  %v833_v32 = vpop.eup %832 }
 0x28f   : > { %v424_v33 = vsel %vm369_vm1, %v833_v32, 0.0  ;;  %v1087_v34 = vpop.eup %834 }
 0x290   : > { %v418_v37 = vsel %vm369_vm1, %v1087_v34, 0.0 }
 0x294   : > { %v232_v38 = vpop.permute.xlu0 %231 }
 0x295   : > { %v297_v39 = vadd.f32 %v1035_v11, %v232_v38 }
 0x296   : > { %434 = vadd.xlane.f32.xlu0 %v433_v30 }
 0x297   : > { %v1093_v40 = vpack.c.bf16 %v297_v39, %v295_v35 }
 0x29e   : > { %425 = vadd.xlane.f32.xlu0 %v424_v33 }
 0x2a6   : > { %419 = vadd.xlane.f32.xlu0 %v418_v37 }
 0x2bf   : > { %v375_v41 = vpop.xlane.xlu0 %374 }
 0x2c0   : > { %v395_v42 = vsub.f32 %v1047_v36, %v375_v41  ;;  %539 = vxpose.xlu1.c.b16.start.end [1/1] (short) (narrow) %v1093_v40, 64 }
 0x2c2   : > { %v404_v43 = vmul.f32 1.442695, %v395_v42 }
 0x2c4   : > { %836 = vpow2.f32 %v404_v43 }
 0x2c5   : > { %838 = vrcp.f32 %v492_v44 }
 0x2c7   : > { %v495_v45 = vpop.xlane.xlu0 %494 }
 0x2c8   : > { %840 = vrcp.f32 %v495_v45 }
 0x2ca   : > { %v837_v46 = vpop.eup %836 }
 0x2cb   : > { %v421_v47 = vsel %vm369_vm1, %v837_v46, 0.0  ;;  %v839_v48 = vpop.eup %838 }
 0x2cc   : > { %422 = vadd.xlane.f32.xlu2 %v421_v47  ;;  %v498_v10 = vmul.f32 %v839_v48, %v1060_v53 }
 0x2ce   : > { %v841_v11 = vpop.eup %840 }
 0x2cf   : > { %v499_v49 = vmul.f32 %v841_v11, %v1069_v60 }
 0x2d1   : > { %v538_v50 = vpack.c.bf16 %v499_v49, %v498_v10 }
 0x2d3   : > { %574 = vmatpush.bf16.msra.mxu2 %v538_v50 }
 0x2e1   : > { %v429_v61 = vpop.xlane.xlu2 %428 }
 0x2e9   : > { %v432_v36 = vpop.xlane.xlu1 %431 }
 0x2f9   : > { %v438_v51 = vpop.xlane.xlu1 %437 }
 0x2fa   : > { %842 = vrcp.f32 %v438_v51 }
 0x300   : > { %v843_v54 = vpop.eup %842 }
 0x301   : > { %v441_v52 = vpop.xlane.xlu0 %440  ;;  %v456_v57 = vmul.f32 %v843_v54, %v827_v18 }
 0x302   : > { %844 = vrcp.f32 %v441_v52 }
 0x303   : > { %846 = vrcp.f32 %v432_v36 }
 0x308   : > { %v845_v55 = vpop.eup %844 }
 0x309   : > { %v435_v56 = vpop.xlane.xlu0 %434  ;;  %v457_v58 = vmul.f32 %v845_v55, %v829_v23  ;;  %v847_v62 = vpop.eup %846 }
 0x30a   : > { %848 = vrcp.f32 %v435_v56  ;;  %v454_v0 = vmul.f32 %v847_v62, %v1077_v8 }
 0x30b   : > { %v503_v59 = vpack.c.bf16 %v457_v58, %v456_v57  ;;  %850 = vrcp.f32 %v429_v61 }
 0x30d   : > { %v517_v53 = vsel %vm369_vm1, %v503_v59, 0 }
 0x30e   : > { %523 = vmatpush.bf16.xpose.msrb.mxu3 %v517_v53 }
 0x310   : > { %v849_v60 = vpop.eup %848 }
 0x311   : > { %v426_v63 = vpop.xlane.xlu0 %425  ;;  %v455_v1 = vmul.f32 %v849_v60, %v831_v28  ;;  %v851_v4 = vpop.eup %850 }
 0x312   : > { %852 = vrcp.f32 %v426_v63  ;;  %v453_v9 = vmul.f32 %v851_v4, %v1073_v5 }
 0x313   : > { %v502_v2 = vpack.c.bf16 %v455_v1, %v454_v0 }
 0x315   : > { %v514_v3 = vsel %vm369_vm1, %v502_v2, 0 }
 0x316   : > { %524 = vmatpush.bf16.xpose.msrb.mxu3 %v514_v3 }
 0x318   : > { %v853_v6 = vpop.eup %852 }
 0x319   : > { %v452_v7 = vmul.f32 %v853_v6, %v833_v32  ;;  %v420_v14 = vpop.xlane.xlu0 %419 }
 0x31a   : > { %854 = vrcp.f32 %v420_v14 }
 0x31b   : > { %v501_v12 = vpack.c.bf16 %v453_v9, %v452_v7 }
 0x31d   : > { %v511_v13 = vsel %vm369_vm1, %v501_v12, 0 }
 0x31e   : > { %525 = vmatpush.bf16.xpose.msrb.mxu3 %v511_v13 }
 0x320   : > { %v855_v8 = vpop.eup %854 }
 0x321   : > { %v450_v17 = vmul.f32 %v855_v8, %v1087_v34 }
 0x33f   : > { %v423_v15 = vpop.xlane.xlu2 %422 }
 0x340   : > { %856 = vrcp.f32 %v423_v15 }
 0x346   : > { %v857_v16 = vpop.eup %856 }
 0x347   : > { %v451_v18 = vmul.f32 %v857_v16, %v837_v46 }
 0x349   : > { %v500_v19 = vpack.c.bf16 %v451_v18, %v450_v17 }
 0x34b   : > { %v508_v20 = vsel %vm369_vm1, %v500_v19, 0 }
 0x34c   : > { %526 = vmatpush.bf16.xpose.msrb.mxu3 %v508_v20 }
 0x353   : > { %757 = vmatmul.msk.bf16.vlgmr.msrb.gmra.mxu3 %vm369_vm1, %v1093_v40 }
 0x36c   : > { %v547_v5 = vpop.trf.xlu1 }
 0x36d   : > { %758 = vmatmul.msk.bf16.vlgmr.msra.gmra.mxu2 %vm275_vm0, %v547_v5 }
 0x37c   : > { %v548_v21 = vpop.trf.xlu1 }
 0x37d   : > { %759 = vmatmul.msk.bf16.gmra.mxu2 %vm275_vm0, %v548_v21 }
 0x38c   : > { %v549_v22 = vpop.trf.xlu1 }
 0x38d   : > { %760 = vmatmul.msk.bf16.gmra.mxu2 %vm275_vm0, %v549_v22 }
 0x39c   : > { %v550_v23 = vpop.trf.xlu1 }
 0x39d   : > { %761 = vmatmul.msk.bf16.gmra.mxu2 %vm275_vm0, %v550_v23 }
 0x3d6   : > { %v528_v24 = vpop.f32.mrf.mxu3 }
 0x3d7   : > { %v533_v25 = vpack.c.bf16 %v528_v24, %v528_v24 }
 0x3d9   : > { %536 = vst.msk [vmem:[%s191_s14] sm:$0xf] %vm535_vm2, %v533_v25 }
 0x3de   : > { %v530_v26 = vpop.f32.mrf.mxu3 }
 0x3df   : > { %v534_v27 = vpack.c.bf16 %v530_v26, %v530_v26 }
 0x3e1   : > { %537 = vst.msk [vmem:[%s191_s14 + $0x4] sm:$0xf] %vm535_vm2, %v534_v27 }
 0x3e2   : > { %885 = shalt.err (!%p882_p3)
}
 0x3e3   : > { %s923_s8 = smov 64   ;;  %s924_s9 = smov 4   ;;  %vm604_vm3 = vcmask 125952  }
 0x3e4   : > { %774 = dma.vmem_to_hbm [thread:$0]  (%p988_p5), %s632_s20, 128, %s634_s22, %s614_s23, %s923_s8, %s923_s8, %s924_s9  }
 0x3e5   : > { %s768_s10 = sshll.u32 %s1006_s5, 5 }
 0x3e6   : > { %s208_s13 = scalar_lea.vmem %s1161_s4, %s768_s10 }
 0x3f0   : > { %v576_v28 = vpop.f32.mrf.mxu2 }
 0x3f1   : > { %v596_v29 = vpack.c.bf16 %v576_v28, %v576_v28 }
 0x3f3   : > { %605 = vst.msk [vmem:[%s208_s13] sm:$0xf] %vm604_vm3, %v596_v29 }
 0x3f8   : > { %v578_v30 = vpop.f32.mrf.mxu2 }
 0x3f9   : > { %v597_v31 = vpack.c.bf16 %v578_v30, %v578_v30 }
 0x3fb   : > { %606 = vst.msk [vmem:[%s208_s13 + $0x4] sm:$0xf] %vm604_vm3, %v597_v31 }
 0x400   : > { %v581_v32 = vpop.f32.mrf.mxu2 }
 0x401   : > { %v598_v33 = vpack.c.bf16 %v581_v32, %v581_v32 }
 0x403   : > { %607 = vst.msk [vmem:[%s208_s13 + $0x8] sm:$0xf] %vm604_vm3, %v598_v33 }
 0x408   : > { %v583_v34 = vpop.f32.mrf.mxu2 }
 0x409   : > { %v599_v37 = vpack.c.bf16 %v583_v34, %v583_v34 }
 0x40b   : > { %608 = vst.msk [vmem:[%s208_s13 + $0xc] sm:$0xf] %vm604_vm3, %v599_v37 }
 0x410   : > { %v586_v38 = vpop.f32.mrf.mxu2 }
 0x411   : > { %v600_v39 = vpack.c.bf16 %v586_v38, %v586_v38 }
 0x413   : > { %609 = vst.msk [vmem:[%s208_s13 + $0x10] sm:$0xf] %vm604_vm3, %v600_v39 }
 0x418   : > { %v588_v35 = vpop.f32.mrf.mxu2 }
 0x419   : > { %v601_v40 = vpack.c.bf16 %v588_v35, %v588_v35 }
 0x41b   : > { %610 = vst.msk [vmem:[%s208_s13 + $0x14] sm:$0xf] %vm604_vm3, %v601_v40 }
 0x420   : > { %v591_v41 = vpop.f32.mrf.mxu2 }
 0x421   : > { %v602_v42 = vpack.c.bf16 %v591_v41, %v591_v41 }
 0x423   : > { %611 = vst.msk [vmem:[%s208_s13 + $0x18] sm:$0xf] %vm604_vm3, %v602_v42 }
 0x428   : > { %v593_v43 = vpop.f32.mrf.mxu2 }
 0x429   : > { %v603_v44 = vpack.c.bf16 %v593_v43, %v593_v43 }
 0x42b   : > { %612 = vst.msk [vmem:[%s208_s13 + $0x1c] sm:$0xf] %vm604_vm3, %v603_v44 }
 0x42c PF: > { %p780_p4 = scmp.ge.s32.totalorder %s920_s18, 2  ;;  %s651_s25 = sand.u32 1, %s908_s15  }
 0x42d   : > { %s652_s5 = scalar_lea.sflag [#allocation3], %s651_s25 }
 0x42e   : > { %p777_p5 = pnand %p780_p4, %p992_p6 }
 0x430   : > { %p778_p7 = pneg %p777_p5 }
 0x432   : > { %903 = dma.done.wait (%p778_p7), %s652_s5, 128  }
 0x433   : > { %905 = vsyncadd (%p778_p7), %s652_s5, 4294967168  ;;  %p15_p8 = scmp.ge.s32.totalorder %s975_s21, 4   ;;  %s1164_s15 = smov %s912_s16 }
 0x434   : > { %s1165_s16 = smov %s916_s17  ;;  %s1166_s17 = smov %s986_s24 }
 0x435   : > { %s1167_s18 = smov %s975_s21  ;;  %17 = sbr.rel (!%p15_p8) target bundleno = 3 (0x3), region = 79 }
 0x43a   :  { %666 = vsyncpa [#allocation3], 1 }
 0x43b   :  { %668 = vsyncpa [#allocation3 + $0x1], 1 }

</bundles_post_ra>
